<compile_context>
chip_gen: v5e
topology: v5e:2x2
jax: 0.10.0
libtpu: 0.0.40
codegen_flags: <defaults>
</compile_context>

<pallas_src>
import functools

import jax
import jax.numpy as jnp
from jax import lax
from jax.experimental import pallas as pl
from jax.experimental.pallas import tpu as pltpu

LANES = 128


def _detect_num_tensorcores():
    """Best-effort TensorCore count per chip (2 on v7x-class parts, else 1)."""
    try:
        info = pltpu.get_tpu_info()
        for attr in ("num_cores", "num_tensorcores", "tensorcore_count",
                     "cores_per_chip", "core_count"):
            v = getattr(info, attr, None)
            if v is not None:
                v = int(v)
                if 1 <= v <= 8:
                    return min(v, 2)
    except Exception:
        pass
    return 1


def _pick_block_rows(rows, itemsize_p, itemsize_t, requested=None):
    """Pick a tile height: big enough to amortize per-step overhead, small
    enough to keep double-buffered VMEM well under every generation's limit."""
    # Native sublane packing of the *narrower* input dtype (8 f32, 16 bf16, 32 i8).
    sub = 8 * max(1, 4 // max(1, min(itemsize_p, itemsize_t)))
    if requested is not None:
        br = int(requested)
    else:
        # Target ~8 MiB of HBM traffic per grid step (both inputs combined):
        # >=2.5us/step even at v7x's 3.2 TB/s, so the ~0.35us fixed per-step
        # overhead stays under ~15% everywhere (and ~6% on v6e, ~3% on v5e).
        target = (8 << 20) // (LANES * (itemsize_p + itemsize_t))
        # VMEM per row: 2 pipeline buffers per input + the f32 accumulator.
        per_row = 2 * LANES * (itemsize_p + itemsize_t) + LANES * 4
        budget = 28 << 20  # leaves headroom on v7x (64 MiB physical VMEM)
        br = min(target, budget // per_row)
    if br >= rows or rows <= sub:
        return rows                      # single full-extent tile (always legal)
    return max(sub, (br // sub) * sub)   # round down to native sublane multiple


def _rmse_kernel(p_ref, t_ref, o_ref, acc_ref, *,
                 tiles_per_core, block_rows, rows, num_full_tiles, needs_mask):
    c = pl.program_id(0)          # "parallel" (core) axis
    j = pl.program_id(1)          # "arbitrary" (reduction) axis

    @pl.when(j == 0)
    def _():
        acc_ref[...] = jnp.zeros_like(acc_ref)

    d = p_ref[...].astype(jnp.float32) - t_ref[...].astype(jnp.float32)
    contrib = d * d

    if needs_mask:
        logical_tile = c * tiles_per_core + j

        # Fast path: tiles fully inside the data accumulate with no masking.
        @pl.when(logical_tile < num_full_tiles)
        def _():
            acc_ref[...] += contrib

        # Slow path (at most one tile per core): zero rows past the real data,
        # including fully-out-of-range (clamped, duplicated) tiles.
        @pl.when(logical_tile >= num_full_tiles)
        def _():
            row0 = logical_tile * block_rows
            row = row0 + lax.broadcasted_iota(jnp.int32, (block_rows, LANES), 0)
            acc_ref[...] += jnp.where(row < rows, contrib, 0.0)
    else:
        acc_ref[...] += contrib

    @pl.when(j == pl.num_programs(1) - 1)
    def _():
        # Sublane-only reduce; the wrapper sums the 128 lanes.  Lane-dense
        # (1,128) store, no masked sub-lane write.
        o_ref[...] = jnp.sum(acc_ref[...], axis=0, keepdims=True)


def rmse_loss(pred, target, *, block_rows=None, num_cores=None):
    """sqrt(mean((pred - target)^2)) — matches torch.sqrt(nn.MSELoss()(pred, target))."""
    assert pred.shape == target.shape, (pred.shape, target.shape)
    n = int(pred.size)
    if n == 0:
        # torch mean of an empty tensor is NaN -> sqrt(NaN) is NaN.
        return jnp.float32(float("nan"))

    flat_p = pred.reshape(-1)
    flat_t = target.reshape(-1)

    full_rows = n // LANES        # 128-lane-aligned prefix
    rem = n % LANES               # <128-element tail, handled in plain jnp
    main = full_rows * LANES

    tail_sum = jnp.float32(0.0)
    if rem:
        td = flat_p[main:].astype(jnp.float32) - flat_t[main:].astype(jnp.float32)
        tail_sum = jnp.sum(td * td)

    if full_rows == 0:
        return jnp.sqrt(tail_sum / jnp.float32(n))

    p2 = flat_p[:main].reshape(full_rows, LANES)
    t2 = flat_t[:main].reshape(full_rows, LANES)
    rows = full_rows

    it_p = jnp.dtype(p2.dtype).itemsize
    it_t = jnp.dtype(t2.dtype).itemsize
    block_rows = _pick_block_rows(rows, it_p, it_t, requested=block_rows)

    num_tiles = pl.cdiv(rows, block_rows)
    if num_cores is None:
        num_cores = _detect_num_tensorcores()   # 1 on v5e/v6e, 2 on v7x-class
    num_cores = max(1, min(int(num_cores), num_tiles))
    tiles_per_core = pl.cdiv(num_tiles, num_cores)

    needs_clamp = (num_cores * tiles_per_core != num_tiles)
    needs_mask = (rows % block_rows != 0) or needs_clamp
    num_full_tiles = rows // block_rows          # tiles fully inside the data

    if needs_clamp:
        # Clamp so the DMA never targets a fully out-of-range block; the
        # duplicated data is zeroed by the (pl.when-gated) in-kernel mask.
        def in_map(c, j):
            return (jnp.minimum(c * tiles_per_core + j, num_tiles - 1), 0)
    else:
        def in_map(c, j):
            return (c * tiles_per_core + j, 0)

    kernel = functools.partial(
        _rmse_kernel,
        tiles_per_core=tiles_per_core,
        block_rows=block_rows,
        rows=rows,
        num_full_tiles=num_full_tiles,
        needs_mask=needs_mask,
    )

    # Explicit VMEM budget: 2 inputs x 2 pipeline buffers + f32 accumulator,
    # plus generous headroom.  Keeps large f32/bf16 tiles legal on v5e's 16 MiB
    # default scoped limit and comfortably under v7x's 64 MiB physical VMEM.
    vmem_bytes = block_rows * LANES * (2 * (it_p + it_t) + 4)
    vmem_limit = max(vmem_bytes + (8 << 20), 32 << 20)

    bytes_accessed = n * (it_p + it_t) + num_cores * LANES * 4
    cost = pl.CostEstimate(flops=3 * n, transcendentals=0,
                           bytes_accessed=bytes_accessed)

    partial_sums = pl.pallas_call(
        kernel,
        out_shape=jax.ShapeDtypeStruct((num_cores, LANES), jnp.float32),
        grid_spec=pltpu.PrefetchScalarGridSpec(
            num_scalar_prefetch=0,
            grid=(num_cores, tiles_per_core),
            in_specs=[
                pl.BlockSpec((block_rows, LANES), in_map),
                pl.BlockSpec((block_rows, LANES), in_map),
            ],
            # One lane-dense partial-sum row per core; constant across the
            # reduction axis -> resident accumulator output.
            out_specs=pl.BlockSpec((1, LANES), lambda c, j: (c, 0)),
            scratch_shapes=[pltpu.VMEM((block_rows, LANES), jnp.float32)],
        ),
        compiler_params=pltpu.CompilerParams(
            dimension_semantics=("parallel", "arbitrary"),
            vmem_limit_bytes=int(vmem_limit),
        ),
        cost_estimate=cost,
    )(p2, t2)

    total = jnp.sum(partial_sums) + tail_sum
    return jnp.sqrt(total / jnp.float32(n))


if __name__ == "__main__":
    key = jax.random.PRNGKey(0)
    k_pred, k_tgt = jax.random.split(key)

    # Small NCHW shape consistent with the PyTorch module's typical use.
    shape = (2, 4, 16, 16)
    pred = jax.random.normal(k_pred, shape, dtype=jnp.float32)
    target = jax.random.normal(k_tgt, shape, dtype=jnp.float32)
    loss = jax.block_until_ready(rmse_loss(pred, target))
    ref = jnp.sqrt(jnp.mean((pred - target) ** 2))
    assert jnp.allclose(loss, ref, rtol=1e-5, atol=1e-6), (loss, ref)

    # Non-lane-aligned shape exercises the jnp tail path (no pad, no copies of
    # the aligned prefix beyond the slice).
    shape2 = (3, 5, 7, 11)
    p2 = jax.random.normal(k_pred, shape2, dtype=jnp.float32)
    t2 = jax.random.normal(k_tgt, shape2, dtype=jnp.float32)
    loss2 = jax.block_until_ready(rmse_loss(p2, t2))
    ref2 = jnp.sqrt(jnp.mean((p2 - t2) ** 2))
    assert jnp.allclose(loss2, ref2, rtol=1e-5, atol=1e-6), (loss2, ref2)

    # Force small tiles so the multi-tile grid + pl.when-gated mask path
    # (rows % block_rows != 0) runs.
    shape3 = (5, 4, 128)
    p3 = jax.random.normal(k_pred, shape3, dtype=jnp.float32)
    t3 = jax.random.normal(k_tgt, shape3, dtype=jnp.float32)
    loss3 = jax.block_until_ready(rmse_loss(p3, t3, block_rows=8))
    ref3 = jnp.sqrt(jnp.mean((p3 - t3) ** 2))
    assert jnp.allclose(loss3, ref3, rtol=1e-5, atol=1e-6), (loss3, ref3)

    # bf16 inputs: dtype-aware sublane rounding + in-kernel f32 upcast.
    p4 = jax.random.normal(k_pred, shape, dtype=jnp.bfloat16)
    t4 = jax.random.normal(k_tgt, shape, dtype=jnp.bfloat16)
    loss4 = jax.block_until_ready(rmse_loss(p4, t4))
    ref4 = jnp.sqrt(jnp.mean((p4.astype(jnp.float32) - t4.astype(jnp.float32)) ** 2))
    assert jnp.allclose(loss4, ref4, rtol=1e-5, atol=1e-6), (loss4, ref4)

    print("KERNEL_OK")
</pallas_src>

<mosaic_0001>
module attributes {stable_mosaic.version = 11 : i64} {
  func.func @_rmse_kernel(%arg0: i32, %arg1: i32, %arg2: memref<16x128xf32, #tpu.memory_space<vmem>>, %arg3: memref<16x128xf32, #tpu.memory_space<vmem>>, %arg4: memref<1x128xf32, #tpu.memory_space<vmem>>, %arg5: memref<16x128xf32, #tpu.memory_space<vmem>>) attributes {dimension_semantics = [#tpu.dimension_semantics<parallel>, #tpu.dimension_semantics<arbitrary>], iteration_bounds = array<i64: 1, 1>, scalar_prefetch = 0 : i64, scratch_operands = 1 : i64, tpu.core_type = #tpu.core_type<tc>, window_params = [{transform_indices = @transform_0, window_bounds = array<i64: 16, 128>}, {transform_indices = @transform_1, window_bounds = array<i64: 16, 128>}, {transform_indices = @transform_2, window_bounds = array<i64: 1, 128>}]} {
    %c0_i32 = arith.constant 0 : i32
    %0 = arith.cmpi eq, %arg1, %c0_i32 : i32
    %1 = arith.extui %0 : i1 to i32
    %c0_i32_0 = arith.constant 0 : i32
    %2 = arith.cmpi ne, %1, %c0_i32_0 : i32
    scf.if %2 {
      %cst = arith.constant 0.000000e+00 : f32
      %13 = vector.broadcast %cst : f32 to vector<16x128xf32>
      %c0_10 = arith.constant 0 : index
      %c0_11 = arith.constant 0 : index
      %14 = vector.load %arg5[%c0_10, %c0_11] : memref<16x128xf32, #tpu.memory_space<vmem>>, vector<16x128xf32>
      tpu.vector_store %arg5[%c0_10, %c0_11], %13 {strides = array<i32>} : memref<16x128xf32, #tpu.memory_space<vmem>>, vector<16x128xf32>,
    } else {
    }
    %c0 = arith.constant 0 : index
    %c0_1 = arith.constant 0 : index
    %3 = vector.load %arg2[%c0, %c0_1] : memref<16x128xf32, #tpu.memory_space<vmem>>, vector<16x128xf32>
    %c0_2 = arith.constant 0 : index
    %c0_3 = arith.constant 0 : index
    %4 = vector.load %arg3[%c0_2, %c0_3] : memref<16x128xf32, #tpu.memory_space<vmem>>, vector<16x128xf32>
    %5 = arith.subf %3, %4 : vector<16x128xf32>
    %6 = arith.mulf %5, %5 : vector<16x128xf32>
    %c0_4 = arith.constant 0 : index
    %c0_5 = arith.constant 0 : index
    %7 = vector.load %arg5[%c0_4, %c0_5] : memref<16x128xf32, #tpu.memory_space<vmem>>, vector<16x128xf32>
    %8 = arith.addf %7, %6 : vector<16x128xf32>
    %c0_6 = arith.constant 0 : index
    %c0_7 = arith.constant 0 : index
    %9 = vector.load %arg5[%c0_6, %c0_7] : memref<16x128xf32, #tpu.memory_space<vmem>>, vector<16x128xf32>
    tpu.vector_store %arg5[%c0_6, %c0_7], %8 {strides = array<i32>} : memref<16x128xf32, #tpu.memory_space<vmem>>, vector<16x128xf32>,
    %c0_i32_8 = arith.constant 0 : i32
    %10 = arith.cmpi eq, %arg1, %c0_i32_8 : i32
    %11 = arith.extui %10 : i1 to i32
    %c0_i32_9 = arith.constant 0 : i32
    %12 = arith.cmpi ne, %11, %c0_i32_9 : i32
    scf.if %12 {
      %c0_10 = arith.constant 0 : index
      %c0_11 = arith.constant 0 : index
      %13 = vector.load %arg5[%c0_10, %c0_11] : memref<16x128xf32, #tpu.memory_space<vmem>>, vector<16x128xf32>
      %cst = arith.constant dense<0.000000e+00> : vector<128xf32>
      %14 = vector.multi_reduction <add>, %13, %cst [0] : vector<16x128xf32> to vector<128xf32>
      %15 = vector.shape_cast %14 : vector<128xf32> to vector<1x128xf32>
      %c0_12 = arith.constant 0 : index
      %c0_13 = arith.constant 0 : index
      %16 = vector.load %arg4[%c0_12, %c0_13] : memref<1x128xf32, #tpu.memory_space<vmem>>, vector<1x128xf32>
      tpu.vector_store %arg4[%c0_12, %c0_13], %15 {strides = array<i32>} : memref<1x128xf32, #tpu.memory_space<vmem>>, vector<1x128xf32>,
    } else {
    }
    return
  }
  func.func @transform_0(%arg0: i32, %arg1: i32) -> (i32, i32) {
    %c1_i32 = arith.constant 1 : i32
    %0 = arith.muli %arg0, %c1_i32 : i32
    %1 = arith.addi %0, %arg1 : i32
    %c0_i32 = arith.constant 0 : i32
    %c0_i32_0 = arith.constant 0 : i32
    return %1, %c0_i32 : i32, i32
  }
  func.func @transform_1(%arg0: i32, %arg1: i32) -> (i32, i32) {
    %c1_i32 = arith.constant 1 : i32
    %0 = arith.muli %arg0, %c1_i32 : i32
    %1 = arith.addi %0, %arg1 : i32
    %c0_i32 = arith.constant 0 : i32
    %c0_i32_0 = arith.constant 0 : i32
    return %1, %c0_i32 : i32, i32
  }
  func.func @transform_2(%arg0: i32, %arg1: i32) -> (i32, i32) {
    %c0_i32 = arith.constant 0 : i32
    %c0_i32_0 = arith.constant 0 : i32
    return %arg0, %c0_i32 : i32, i32
  }
}

</mosaic_0001>

<bundles_post_ra>
// kernel: tpu_custom_call.1
= control target key start
LH: loop header
LB: loop body
LE: loop exit
PB: predicated region body
PF: predicated region fallthrough
CT: control target
= control target key end

     0   :  { %7 = vsyncpa [#allocation4], 0  ;;  %s219_s0 = inlined_call_operand.hbm [shape: f32[16,128], index: 0, kind: input, shape index: {}]   ;;  %s220_s1 = inlined_call_operand.hbm [shape: f32[16,128], index: 1, kind: input, shape index: {}]   ;;  %s221_s2 = inlined_call_operand.hbm [shape: f32[1,128], index: 2, kind: output, shape index: {}]  }
   0x1   :  { %8 = vsyncpa [#allocation7], 0 }
   0x2   :  { %9 = vsyncpa [#allocation5], 0  ;;  %s18_s11 = sshll.u32 %s219_s0, 4  ;;  %s190_s12 = smov [#allocation3]   ;;  %s19_s11 = int_to_ptr.hbm [resolvable:$true] %s18_s11 }
   0x3   :  { %s20_s13 = sshll.u32 %s190_s12, 4  ;;  %s35_s16 = sshll.u32 %s220_s1, 4  ;;  %s21_s13 = int_to_ptr.vmem [resolvable:$true] %s20_s13  ;;  %s36_s16 = int_to_ptr.hbm [resolvable:$true] %s35_s16 }
   0x4   :  { %s191_s17 = smov 128   ;;  %s192_s18 = smov 8  }
   0x5   :  { %26 = dma.hbm_to_vmem [thread:$0]  %s19_s11, 256, %s21_s13, [#allocation4], %s191_s17, %s191_s17, %s192_s18  }
   0x6   :  { %s193_s19 = smov [#allocation6]  }
   0x7   :  { %s37_s20 = sshll.u32 %s193_s19, 4  ;;  %s38_s20 = int_to_ptr.vmem [resolvable:$true] %s37_s20 }
   0x8   :  { %43 = dma.hbm_to_vmem [thread:$0]  %s36_s16, 256, %s38_s20, [#allocation7], %s191_s17, %s191_s17, %s192_s18  }
   0x9   :  { %184 = dma.done.wait [#allocation4], 256  }
   0xa   :  { %185 = vsyncadd [#allocation4], 4294967040 }
   0xb   :  { %186 = dma.done.wait [#allocation7], 256  }
   0xc   :  { %187 = vsyncadd [#allocation7], 4294967040  ;;  %v62_v0 = vld [vmem:[#allocation3] sm:$0xff]  ;;  %v63_v1 = vld [vmem:[#allocation3 + $0x8] sm:$0xff]  ;;  %s194_s0 = smov [#allocation8]   ;;  %s96_s23 = sshll.u32 %s221_s2, 4  ;;  %s97_s23 = int_to_ptr.hbm [resolvable:$true] %s96_s23 }
   0xd   :  { %v64_v2 = vld [vmem:[#allocation6] sm:$0xff]  ;;  %v65_v3 = vld [vmem:[#allocation6 + $0x8] sm:$0xff]  ;;  %s94_s1 = sshll.u32 %s194_s0, 4  ;;  %s95_s1 = int_to_ptr.vmem [resolvable:$true] %s94_s1 }
   0xe   :  { %v66_v4 = vsub.f32 %v62_v0, %v64_v2  ;;  %v67_v5 = vsub.f32 %v63_v1, %v65_v3 }
  0x10   :  { %v68_v6 = vmul.f32 %v66_v4, %v66_v4  ;;  %v69_v7 = vmul.f32 %v67_v5, %v67_v5 }
  0x12   :  { %v81_v8 = vadd.f32 %v69_v7, %v68_v6 }
  0x14   :  { %v82_v9 = vrot.slane %v81_v8, 4 }
  0x16   :  { %v83_v10 = vadd.f32 %v82_v9, %v81_v8 }
  0x18   :  { %v84_v11 = vrot.slane %v83_v10, 2 }
  0x1a   :  { %v85_v12 = vadd.f32 %v84_v11, %v83_v10 }
  0x1c   :  { %v86_v13 = vrot.slane %v85_v12, 1 }
  0x1e   :  { %v87_v14 = vadd.f32 %v86_v13, %v85_v12 }
  0x20   :  { %88 = vst [vmem:[#allocation8] sm:$0x1] %v87_v14 }
  0x21   :  { %99 = dma.vmem_to_hbm [thread:$0]  %s95_s1, 16, %s97_s23, [#allocation5]  }
  0x22   :  { %188 = dma.done.wait [#allocation5], 16  }
  0x23   :  { %189 = vsyncadd [#allocation5], 4294967280 }
  0x24   :  { %104 = vsyncpa [#allocation4], 1 }
  0x25   :  { %105 = vsyncpa [#allocation7], 1 }
  0x26   :  { %106 = vsyncpa [#allocation5], 1 }

</bundles_post_ra>
